<compile_context>
chip_gen: v7x
topology: tpu7x:2x2x1
jax: 0.10.0
libtpu: 0.0.40
codegen_flags: <defaults>
</compile_context>

<pallas_src>
import math
import jax
import jax.numpy as jnp
from jax import lax
from jax.experimental import pallas as pl
from jax.experimental.pallas import tpu as pltpu


def _round_up(n, m):
    return ((n + m - 1) // m) * m


def _vmem_capacity_bytes():
    """Physical VMEM per TensorCore; conservative fallback if the query fails."""
    try:
        cap = getattr(pltpu.get_tpu_info(), "vmem_capacity_bytes", None)
        if cap:
            return int(cap)
    except Exception:
        pass
    return 64 << 20  # v7x per-TC size: a safe lower bound on all generations


def _vmem_need_bytes(tile_rows, in_dim, hidden, out_dim, tile_h, isz_io, isz_w):
    """Rough VMEM requirement for one grid step (weights counted once when resident)."""
    io = 2 * tile_rows * (in_dim + out_dim) * isz_io            # double-buffered x / out tiles
    if tile_h == hidden:                                        # whole weights resident, single copy
        w = (in_dim * hidden + hidden * out_dim) * isz_w + (hidden + out_dim) * 4
    else:                                                       # blocked weights, double-buffered
        w = 2 * ((in_dim * tile_h + tile_h * out_dim) * isz_w + tile_h * 4) + out_dim * 4
    acc = tile_rows * out_dim * 4                               # f32 accumulator scratch
    inter = tile_rows * (tile_h * 6 + in_dim * 2)               # f32+bf16 GELU temp, x cast
    return io + w + acc + inter


def _make_ffn_kernel(use_bf16):
    inv_sqrt2 = 1.0 / math.sqrt(2.0)

    def ffn_kernel(x_ref, w1_ref, b1_ref, w2_ref, b2_ref, o_ref, acc_ref):
        k = pl.program_id(1)                                    # hidden-chunk (reduction) axis

        @pl.when(k == 0)
        def _():
            acc_ref[...] = jnp.zeros_like(acc_ref)

        x = x_ref[...]
        if use_bf16:
            x = x.astype(jnp.bfloat16)                          # bf16 MXU operands, f32 accumulate

        # lin1 (this hidden chunk): x @ W1[:, hk] + b1[hk]
        h = jnp.dot(x, w1_ref[...], preferred_element_type=jnp.float32)
        h = h + b1_ref[...]                                     # b1 pre-cast to f32 in wrapper

        # erf-GELU, exactly as in the reference module (f32 math; erf goes to the EUP/VPU).
        h = 0.5 * h * (1.0 + lax.erf(h * inv_sqrt2))

        # lin2 partial product, accumulated in f32.
        h = h.astype(jnp.bfloat16) if use_bf16 else h.astype(w2_ref.dtype)
        acc_ref[...] += jnp.dot(h, w2_ref[...], preferred_element_type=jnp.float32)

        @pl.when(k == pl.num_programs(1) - 1)
        def _():
            # Dropout with training=False is identity.
            # TODO(synk): training-mode dropout (pltpu.prng_random_bits mask) not emitted.
            o_ref[...] = (acc_ref[...] + b2_ref[...]).astype(o_ref.dtype)

    return ffn_kernel


def transformer_ffn(x, w1, b1, w2, b2, *, use_bf16_matmul=True,
                    tile_rows=None, tile_h=None, vmem_limit_bytes=None):
    """x: [B, S, in_dim]; weights stored [in, out] (== PyTorch weight.T).

    Returns [B, S, out_dim] in x.dtype.
    """
    B, S, in_dim = x.shape
    hidden = w1.shape[1]
    out_dim = w2.shape[1]
    M = B * S

    x2 = x.reshape(M, in_dim)

    # Feed the MXU bf16 weights (one-time cast; in a real model they'd be stored bf16).
    if use_bf16_matmul:
        w1 = w1.astype(jnp.bfloat16)
        w2 = w2.astype(jnp.bfloat16)
    # Biases pre-cast to f32 once (kernel adds them with no per-step cast).
    b1_2 = b1.reshape(1, hidden).astype(jnp.float32)
    b2_2 = b2.reshape(1, out_dim).astype(jnp.float32)

    isz_io = jnp.dtype(x.dtype).itemsize
    isz_w = jnp.dtype(w1.dtype).itemsize

    cap = _vmem_capacity_bytes()
    budget = int(cap) * 3 // 4          # headroom for compiler scratch / sems / DMA buffers

    # Row tile: 512 on 128-MiB-VMEM parts (v5e/v6e), 256 on v7x; multiple of 16 (bf16
    # sublane pack, also divisible by 8 for f32); clamped so tiny problems stay one block.
    if tile_rows is None:
        tile_rows = 512 if cap >= (96 << 20) else 256
    tile_rows = max(16, min(_round_up(tile_rows, 16), _round_up(M, 16)))

    # Hidden tile: whole hidden if it fits the budget; otherwise the largest divisor of
    # hidden that is a multiple of 128 and fits (keeps the reduction free of OOB garbage).
    if tile_h is None:
        candidates = [hidden] + [c for c in (4096, 2048, 1024, 512, 256, 128)
                                 if c < hidden and hidden % c == 0]
        tile_h = candidates[-1]
        for c in candidates:
            if _vmem_need_bytes(tile_rows, in_dim, hidden, out_dim, c, isz_io, isz_w) <= budget:
                tile_h = c
                break
    else:
        assert hidden % tile_h == 0, "tile_h must divide hidden"
        assert tile_h == hidden or tile_h % 128 == 0, "blocked tile_h must be a multiple of 128"

    num_h = hidden // tile_h
    grid = (pl.cdiv(M, tile_rows), num_h)

    if vmem_limit_bytes is None:
        need = _vmem_need_bytes(tile_rows, in_dim, hidden, out_dim, tile_h, isz_io, isz_w)
        vmem_limit_bytes = int(min(max(need + (2 << 20), 16 << 20), budget))

    # Grid-invariant operands: whole-array, single-copy VMEM residency (no per-step
    # re-fetch, no double buffering).  When hidden is tiled, W1/b1/W2 are pipelined blocks.
    resident = pl.BlockSpec(memory_space=pltpu.MemorySpace.VMEM)
    if num_h == 1:
        w1_spec = b1_spec = w2_spec = resident
    else:
        w1_spec = pl.BlockSpec((in_dim, tile_h), lambda i, k: (0, k))
        b1_spec = pl.BlockSpec((1, tile_h), lambda i, k: (0, k))
        w2_spec = pl.BlockSpec((tile_h, out_dim), lambda i, k: (k, 0))

    # NOTE: for lane-dense (unmasked) output stores out_dim should be a multiple of 128;
    # typical FFN widths already are, so no wrapper-side output padding is done here.
    out = pl.pallas_call(
        _make_ffn_kernel(use_bf16_matmul),
        out_shape=jax.ShapeDtypeStruct((M, out_dim), x.dtype),
        grid_spec=pltpu.PrefetchScalarGridSpec(
            num_scalar_prefetch=0,
            grid=grid,
            in_specs=[
                pl.BlockSpec((tile_rows, in_dim), lambda i, k: (i, 0)),  # x row tile (pipelined)
                w1_spec,      # W1 (whole-resident, or (in_dim, tile_h) blocks)
                b1_spec,      # b1 (f32)
                w2_spec,      # W2
                resident,     # b2 (f32, single copy)
            ],
            out_specs=pl.BlockSpec((tile_rows, out_dim), lambda i, k: (i, 0)),
            scratch_shapes=[pltpu.VMEM((tile_rows, out_dim), jnp.float32)],
        ),
        compiler_params=pltpu.CompilerParams(
            dimension_semantics=("parallel", "arbitrary"),   # rows across TCs, hidden = reduction
            vmem_limit_bytes=vmem_limit_bytes),
    )(x2, w1, b1_2, w2, b2_2)
    return out.reshape(B, S, out_dim)


def init_linear_params(key, in_features, out_features):
    """Deterministic init mirroring nn.Linear: U(-1/sqrt(in), 1/sqrt(in))."""
    kw, kb = jax.random.split(key)
    bound = 1.0 / math.sqrt(in_features)
    # Stored as [in, out] so the kernel computes x @ W (== PyTorch x @ weight.T).
    w = jax.random.uniform(kw, (in_features, out_features), jnp.float32,
                           minval=-bound, maxval=bound)
    b = jax.random.uniform(kb, (out_features,), jnp.float32,
                           minval=-bound, maxval=bound)
    return w, b


def _ffn_reference(x, w1, b1, w2, b2):
    """Pure-JAX reference: lin1 -> erf-GELU -> lin2 (dropout in eval mode)."""
    B, S, in_dim = x.shape
    h = x.reshape(-1, in_dim) @ w1 + b1
    h = 0.5 * h * (1.0 + lax.erf(h / math.sqrt(2.0)))
    return (h @ w2 + b2).reshape(B, S, w2.shape[1])


if __name__ == "__main__":
    key = jax.random.PRNGKey(0)
    k_in, k1, k2, k_in2, k3, k4 = jax.random.split(key, 6)

    # Small shapes consistent with the module's FFN: batch=2, seq=8, in=32, hidden=64, out=32.
    B, S, in_dim, dim_hidden, out_dim = 2, 8, 32, 64, 32

    x = jax.random.normal(k_in, (B, S, in_dim), jnp.float32)
    w1, b1 = init_linear_params(k1, in_dim, dim_hidden)
    w2, b2 = init_linear_params(k2, dim_hidden, out_dim)
    y_ref = _ffn_reference(x, w1, b1, w2, b2)

    # Exact f32 path (no bf16 operand casts): tight check vs pure-JAX reference.
    y_f32 = jax.block_until_ready(transformer_ffn(x, w1, b1, w2, b2, use_bf16_matmul=False))
    assert jnp.allclose(y_f32, y_ref, atol=1e-5, rtol=1e-5), "f32 mismatch vs reference"

    # Default path: bf16 MXU operands, f32 accumulation — relaxed tolerance.
    y_bf = jax.block_until_ready(transformer_ffn(x, w1, b1, w2, b2))
    assert jnp.allclose(y_bf, y_ref, atol=5e-2, rtol=5e-2), "bf16-matmul mismatch vs reference"

    # Non-divisible row count (M=21) exercises the ragged last block / masked stores
    # (no host-side pad or slice anymore).
    x_odd = jax.random.normal(k_in2, (3, 7, in_dim), jnp.float32)
    y_odd = jax.block_until_ready(
        transformer_ffn(x_odd, w1, b1, w2, b2, use_bf16_matmul=False))
    assert jnp.allclose(y_odd, _ffn_reference(x_odd, w1, b1, w2, b2),
                        atol=1e-5, rtol=1e-5), "ragged-M mismatch vs reference"

    # Forced hidden-dim tiling (accumulator path): hidden=256 split into 2 chunks of 128.
    w1b, b1b = init_linear_params(k3, in_dim, 256)
    w2b, b2b = init_linear_params(k4, 256, out_dim)
    y_ht = jax.block_until_ready(
        transformer_ffn(x, w1b, b1b, w2b, b2b, use_bf16_matmul=False, tile_h=128))
    assert jnp.allclose(y_ht, _ffn_reference(x, w1b, b1b, w2b, b2b),
                        atol=1e-4, rtol=1e-4), "hidden-tiled mismatch vs reference"

    # bf16 storage path (MXU-native dtype, f32 accumulation) — relaxed tolerance.
    y_bf16 = jax.block_until_ready(
        transformer_ffn(x.astype(jnp.bfloat16),
                        w1.astype(jnp.bfloat16), b1.astype(jnp.bfloat16),
                        w2.astype(jnp.bfloat16), b2.astype(jnp.bfloat16)))
    assert jnp.allclose(y_bf16.astype(jnp.float32), y_ref, atol=5e-2, rtol=5e-2), \
        "bf16-storage mismatch vs f32 reference"

    print("KERNEL_OK")
</pallas_src>

<mosaic_0001>
module attributes {stable_mosaic.version = 11 : i64} {
  func.func @ffn_kernel(%arg0: i32, %arg1: i32, %arg2: memref<16x32xf32, #tpu.memory_space<vmem>>, %arg3: memref<32x64xf32, #tpu.memory_space<vmem>>, %arg4: memref<1x64xf32, #tpu.memory_space<vmem>>, %arg5: memref<64x32xf32, #tpu.memory_space<vmem>>, %arg6: memref<1x32xf32, #tpu.memory_space<vmem>>, %arg7: memref<16x32xf32, #tpu.memory_space<vmem>>, %arg8: memref<16x32xf32, #tpu.memory_space<vmem>>) attributes {dimension_semantics = [#tpu.dimension_semantics<parallel>, #tpu.dimension_semantics<arbitrary>], iteration_bounds = array<i64: 1, 1>, scalar_prefetch = 0 : i64, scratch_operands = 1 : i64, tpu.core_type = #tpu.core_type<tc>, window_params = [{transform_indices = @transform_0, window_bounds = array<i64: 16, 32>}, {pipeline_mode = #tpu.pipeline_mode<synchronous>, transform_indices = @transform_1, window_bounds = array<i64: 32, 64>}, {pipeline_mode = #tpu.pipeline_mode<synchronous>, transform_indices = @transform_2, window_bounds = array<i64: 1, 64>}, {pipeline_mode = #tpu.pipeline_mode<synchronous>, transform_indices = @transform_3, window_bounds = array<i64: 64, 32>}, {pipeline_mode = #tpu.pipeline_mode<synchronous>, transform_indices = @transform_4, window_bounds = array<i64: 1, 32>}, {transform_indices = @transform_5, window_bounds = array<i64: 16, 32>}]} {
    %c0_i32 = arith.constant 0 : i32
    %0 = arith.cmpi eq, %arg1, %c0_i32 : i32
    %1 = arith.extui %0 : i1 to i32
    %c0_i32_0 = arith.constant 0 : i32
    %2 = arith.cmpi ne, %1, %c0_i32_0 : i32
    scf.if %2 {
      %cst_18 = arith.constant 0.000000e+00 : f32
      %25 = vector.broadcast %cst_18 : f32 to vector<16x32xf32>
      %c0_19 = arith.constant 0 : index
      %c0_20 = arith.constant 0 : index
      %26 = vector.load %arg8[%c0_19, %c0_20] : memref<16x32xf32, #tpu.memory_space<vmem>>, vector<16x32xf32>
      tpu.vector_store %arg8[%c0_19, %c0_20], %25 {strides = array<i32>} : memref<16x32xf32, #tpu.memory_space<vmem>>, vector<16x32xf32>,
    } else {
    }
    %c0 = arith.constant 0 : index
    %c0_1 = arith.constant 0 : index
    %3 = vector.load %arg2[%c0, %c0_1] : memref<16x32xf32, #tpu.memory_space<vmem>>, vector<16x32xf32>
    %c0_2 = arith.constant 0 : index
    %c0_3 = arith.constant 0 : index
    %4 = vector.load %arg3[%c0_2, %c0_3] : memref<32x64xf32, #tpu.memory_space<vmem>>, vector<32x64xf32>
    %cst = arith.constant dense<0.000000e+00> : vector<16x64xf32>
    %5 = tpu.matmul %3, %4, %cst {dimension_numbers = #tpu.dot_dimension_numbers<[1], [0], [0], [1], [0, 0, 1, 1], [], []>} : vector<16x32xf32>, vector<32x64xf32>, vector<16x64xf32> -> vector<16x64xf32>
    %c0_4 = arith.constant 0 : index
    %c0_5 = arith.constant 0 : index
    %6 = vector.load %arg4[%c0_4, %c0_5] : memref<1x64xf32, #tpu.memory_space<vmem>>, vector<1x64xf32>
    %7 = vector.broadcast %6 : vector<1x64xf32> to vector<16x64xf32>
    %8 = arith.addf %5, %7 : vector<16x64xf32>
    %cst_6 = arith.constant 5.000000e-01 : f32
    %9 = vector.broadcast %cst_6 : f32 to vector<16x64xf32>
    %10 = arith.mulf %9, %8 : vector<16x64xf32>
    %cst_7 = arith.constant 0.707106769 : f32
    %11 = vector.broadcast %cst_7 : f32 to vector<16x64xf32>
    %12 = arith.mulf %8, %11 : vector<16x64xf32>
    %13 = math.erf %12 : vector<16x64xf32>
    %cst_8 = arith.constant 1.000000e+00 : f32
    %14 = vector.broadcast %cst_8 : f32 to vector<16x64xf32>
    %15 = arith.addf %14, %13 : vector<16x64xf32>
    %16 = arith.mulf %10, %15 : vector<16x64xf32>
    %c0_9 = arith.constant 0 : index
    %c0_10 = arith.constant 0 : index
    %17 = vector.load %arg8[%c0_9, %c0_10] : memref<16x32xf32, #tpu.memory_space<vmem>>, vector<16x32xf32>
    %c0_11 = arith.constant 0 : index
    %c0_12 = arith.constant 0 : index
    %18 = vector.load %arg5[%c0_11, %c0_12] : memref<64x32xf32, #tpu.memory_space<vmem>>, vector<64x32xf32>
    %cst_13 = arith.constant dense<0.000000e+00> : vector<16x32xf32>
    %19 = tpu.matmul %16, %18, %cst_13 {dimension_numbers = #tpu.dot_dimension_numbers<[1], [0], [0], [1], [0, 0, 1, 1], [], []>} : vector<16x64xf32>, vector<64x32xf32>, vector<16x32xf32> -> vector<16x32xf32>
    %20 = arith.addf %17, %19 : vector<16x32xf32>
    %c0_14 = arith.constant 0 : index
    %c0_15 = arith.constant 0 : index
    %21 = vector.load %arg8[%c0_14, %c0_15] : memref<16x32xf32, #tpu.memory_space<vmem>>, vector<16x32xf32>
    tpu.vector_store %arg8[%c0_14, %c0_15], %20 {strides = array<i32>} : memref<16x32xf32, #tpu.memory_space<vmem>>, vector<16x32xf32>,
    %c0_i32_16 = arith.constant 0 : i32
    %22 = arith.cmpi eq, %arg1, %c0_i32_16 : i32
    %23 = arith.extui %22 : i1 to i32
    %c0_i32_17 = arith.constant 0 : i32
    %24 = arith.cmpi ne, %23, %c0_i32_17 : i32
    scf.if %24 {
      %c0_18 = arith.constant 0 : index
      %c0_19 = arith.constant 0 : index
      %25 = vector.load %arg8[%c0_18, %c0_19] : memref<16x32xf32, #tpu.memory_space<vmem>>, vector<16x32xf32>
      %c0_20 = arith.constant 0 : index
      %c0_21 = arith.constant 0 : index
      %26 = vector.load %arg6[%c0_20, %c0_21] : memref<1x32xf32, #tpu.memory_space<vmem>>, vector<1x32xf32>
      %27 = vector.broadcast %26 : vector<1x32xf32> to vector<16x32xf32>
      %28 = arith.addf %25, %27 : vector<16x32xf32>
      %c0_22 = arith.constant 0 : index
      %c0_23 = arith.constant 0 : index
      %29 = vector.load %arg7[%c0_22, %c0_23] : memref<16x32xf32, #tpu.memory_space<vmem>>, vector<16x32xf32>
      tpu.vector_store %arg7[%c0_22, %c0_23], %28 {strides = array<i32>} : memref<16x32xf32, #tpu.memory_space<vmem>>, vector<16x32xf32>,
    } else {
    }
    return
  }
  func.func @transform_0(%arg0: i32, %arg1: i32) -> (i32, i32) {
    %c0_i32 = arith.constant 0 : i32
    %c0_i32_0 = arith.constant 0 : i32
    return %arg0, %c0_i32 : i32, i32
  }
  func.func @transform_1(%arg0: i32, %arg1: i32) -> (i32, i32) {
    %c0_i32 = arith.constant 0 : i32
    %c0_i32_0 = arith.constant 0 : i32
    %c0_i32_1 = arith.constant 0 : i32
    return %c0_i32, %c0_i32_0 : i32, i32
  }
  func.func @transform_2(%arg0: i32, %arg1: i32) -> (i32, i32) {
    %c0_i32 = arith.constant 0 : i32
    %c0_i32_0 = arith.constant 0 : i32
    %c0_i32_1 = arith.constant 0 : i32
    return %c0_i32, %c0_i32_0 : i32, i32
  }
  func.func @transform_3(%arg0: i32, %arg1: i32) -> (i32, i32) {
    %c0_i32 = arith.constant 0 : i32
    %c0_i32_0 = arith.constant 0 : i32
    %c0_i32_1 = arith.constant 0 : i32
    return %c0_i32, %c0_i32_0 : i32, i32
  }
  func.func @transform_4(%arg0: i32, %arg1: i32) -> (i32, i32) {
    %c0_i32 = arith.constant 0 : i32
    %c0_i32_0 = arith.constant 0 : i32
    %c0_i32_1 = arith.constant 0 : i32
    return %c0_i32, %c0_i32_0 : i32, i32
  }
  func.func @transform_5(%arg0: i32, %arg1: i32) -> (i32, i32) {
    %c0_i32 = arith.constant 0 : i32
    %c0_i32_0 = arith.constant 0 : i32
    return %arg0, %c0_i32 : i32, i32
  }
}

</mosaic_0001>

<bundles_post_ra>
// kernel: tpu_custom_call.1
= control target key start
LH: loop header
LB: loop body
LE: loop exit
PB: predicated region body
PF: predicated region fallthrough
CT: control target
= control target key end

     0   :  { %vm25_vm0 = vcmask 261120   ;;  %s471_s0 = inlined_call_operand.vmem [shape: f32[16,32], index: 0, kind: input, shape index: {}]   ;;  %s472_s1 = inlined_call_operand.vmem [shape: f32[32,64], index: 1, kind: input, shape index: {}]   ;;  %s473_s2 = inlined_call_operand.vmem [shape: f32[1,64], index: 2, kind: input, shape index: {}]   ;;  %s474_s3 = inlined_call_operand.vmem [shape: f32[64,32], index: 3, kind: input, shape index: {}]   ;;  %s475_s4 = inlined_call_operand.vmem [shape: f32[1,32], index: 4, kind: input, shape index: {}]   ;;  %s476_s5 = inlined_call_operand.hbm [shape: f32[16,32], index: 5, kind: output, shape index: {}]  }
   0x1   :  { %v30_v0 = vld [vmem:[%s472_s1] sm:$0xff]  ;;  %v31_v1 = vld [vmem:[%s472_s1 + $0x8] sm:$0xff]  ;;  %v32_v2 = vld [vmem:[%s472_s1 + $0x10] sm:$0xff] }
   0x2   :  { %v313_v3 = vpack.c.bf16 %v31_v1, %v30_v0  ;;  %v33_v4 = vld [vmem:[%s472_s1 + $0x18] sm:$0xff]  ;;  %v28_v5 = vld [vmem:[%s471_s0] sm:$0xff] }
   0x3   :  { %v317_v6 = vpack.c.bf16 %v33_v4, %v32_v2  ;;  %291 = vmatprep.mubr.msk.f32.mxu0 %vm25_vm0, %v28_v5 }
   0x4   :  { %10 = vsyncpa [#allocation4], 0  ;;  %314 = vmatprep.subr.bf16.mxu0 %v313_v3  ;;  %v29_v7 = vld [vmem:[%s471_s0 + $0x8] sm:$0xff]  ;;  %v135_v8 = vld [vmem:[%s474_s3] sm:$0xff]  ;;  %v369_v20 = vmov 0.0   ;;  %vm143_vm1 = vcmask 523264  }
   0x5   :  { %316 = vmatpush3.bf16.msra.mxu0 %v313_v3  ;;  %v136_v9 = vld [vmem:[%s474_s3 + $0x8] sm:$0xff]  ;;  %v137_v11 = vld [vmem:[%s474_s3 + $0x10] sm:$0xff]  ;;  %v138_v12 = vld [vmem:[%s474_s3 + $0x18] sm:$0xff]  ;;  %27 = vst.msk [vmem:[#allocation2 + $0x8] sm:$0xff] %vm25_vm0, %v369_v20  ;;  %s370_s21 = smov [#allocation3]  }
   0x6   :  { %318 = vmatprep.subr.bf16.mxu0 %v317_v6  ;;  %v321_v10 = vpack.c.bf16 %v136_v9, %v135_v8  ;;  %v325_v13 = vpack.c.bf16 %v138_v12, %v137_v11  ;;  %v139_v14 = vld [vmem:[%s474_s3 + $0x20] sm:$0xff]  ;;  %v140_v15 = vld [vmem:[%s474_s3 + $0x28] sm:$0xff]  ;;  %v141_v17 = vld [vmem:[%s474_s3 + $0x30] sm:$0xff]  ;;  %26 = vst.msk [vmem:[#allocation2] sm:$0xff] %vm25_vm0, %v369_v20  ;;  %s250_s22 = sshll.u32 %s370_s21, 4  ;;  %s251_s22 = int_to_ptr.vmem [resolvable:$true] %s250_s22 }
   0x7   :  { %v329_v16 = vpack.c.bf16 %v140_v15, %v139_v14  ;;  %v142_v18 = vld [vmem:[%s474_s3 + $0x38] sm:$0xff]  ;;  %v261_v21 = vld [vmem:[%s473_s2] ss:$0 sm:$0xff]  ;;  %s345_s23 = scalar_lea.vmem %s251_s22, 256  ;;  %p350_p1 = scmp.lt.s32.totalorder %s251_s22, %s251_s22 }
   0x8   :  { %322 = vmatprep.subr.bf16.mxu1 %v321_v10  ;;  %v333_v19 = vpack.c.bf16 %v142_v18, %v141_v17  ;;  %v266_v42 = vld [vmem:[%s475_s4] ss:$0 sm:$0xff]  ;;  %p346_p0 = scmp.ne.s32.totalorder %s251_s22, %s345_s23  ;;  %p351_p2 = scmp.lt.s32.totalorder %s345_s23, %s345_s23 }
   0x9   :  { %320 = vmatpush3.bf16.msra.mxu0 %v317_v6  ;;  %324 = vmatpush3.bf16.msra.mxu1 %v321_v10 }
   0xa   :  { %326 = vmatprep.subr.bf16.mxu1 %v325_v13  ;;  %p352_p3 = por %p351_p2, %p350_p1 }
   0xc   :  { %292 = vmatmul.mubr.msk.f32.vlgmr.msra.gmra.mrb[0].mxu0 %vm25_vm0, %v29_v7  ;;  %v134_v36 = vld [vmem:[#allocation2 + $0x8] sm:$0xff]  ;;  %p353_p4 = pnand %p352_p3, %p346_p0 }
   0xd   :  { %328 = vmatpush3.bf16.msra.mxu1 %v325_v13  ;;  %v133_v37 = vld [vmem:[#allocation2] sm:$0xff] }
   0xe   :  { %330 = vmatprep.subr.bf16.mxu1 %v329_v16 }
  0x11   :  { %332 = vmatpush3.bf16.msra.mxu1 %v329_v16 }
  0x12   :  { %334 = vmatprep.subr.bf16.mxu1 %v333_v19 }
  0x15   :  { %336 = vmatpush3.bf16.msra.mxu1 %v333_v19 }
  0xdf   :  { %v293_v22 = vpop.f32.mrb[0].mxu0 }
  0xe0   :  { %v120_v23 = vadd.f32 %v293_v22, %v261_v21  ;;  %v114_v24 = vpop.f32.mrb[1].mxu0 }
  0xe1   :  { %v115_v25 = vadd.f32 %v261_v21, %v114_v24 }
  0xe2   :  { %v126_v26 = vmul.f32 0.70710677, %v120_v23  ;;  %v124_v33 = vmul.f32 0.5, %v120_v23 }
  0xe3   :  { %v125_v27 = vmul.f32 0.70710677, %v115_v25  ;;  %v123_v31 = vmul.f32 0.5, %v115_v25 }
  0xe4   :  { %341 = verf.f32 %v126_v26 }
  0xe5   :  { %343 = verf.f32 %v125_v27 }
  0xee   :  { %v342_v28 = vpop.eup %341 }
  0xef   :  { %v344_v29 = vpop.eup %343  ;;  %v130_v30 = vadd.f32 1.0, %v342_v28 }
  0xf0   :  { %v129_v32 = vadd.f32 1.0, %v344_v29 }
  0xf1   :  { %v132_v35 = vmul.f32 %v130_v30, %v124_v33 }
  0xf2   :  { %v131_v34 = vmul.f32 %v129_v32, %v123_v31 }
  0xf4   :  { %310 = vmatprep.mubr.msk.f32.mxu1 %vm143_vm1, %v131_v34 }
  0xf5   :  { %311 = vmatmul.mubr.msk.f32.vlgmr.msra.gmra.mrb[0].mxu1 %vm143_vm1, %v132_v35 }
 0x1c8   :  { %v312_v38 = vpop.f32.mrb[0].mxu1 }
 0x1c9   :  { %v226_v39 = vadd.f32 %v312_v38, %v134_v36  ;;  %v216_v40 = vpop.f32.mrb[1].mxu1 }
 0x1ca   :  { %v225_v41 = vadd.f32 %v216_v40, %v133_v37 }
 0x1cb   :  { %228 = vst.msk [vmem:[#allocation2 + $0x8] sm:$0xff] %vm25_vm0, %v226_v39 }
 0x1cc   :  { %227 = vst.msk [vmem:[#allocation2] sm:$0xff] %vm25_vm0, %v225_v41 }
 0x1d2   :  { %v233_v43 = vld [vmem:[#allocation2 + $0x8] sm:$0xff] }
 0x1d3   :  { %v232_v44 = vld [vmem:[#allocation2] sm:$0xff]  ;;  %v242_v45 = vadd.f32 %v266_v42, %v233_v43 }
 0x1d4   :  { %v241_v46 = vadd.f32 %v266_v42, %v232_v44 }
 0x1d5   :  { %244 = vst.msk [vmem:[#allocation3 + $0x8] sm:$0xff] %vm25_vm0, %v242_v45 }
 0x1d6   :  { %243 = vst.msk [vmem:[#allocation3] sm:$0xff] %vm25_vm0, %v241_v46 }
 0x1d7   :  { %356 = shalt.err (!%p353_p4)
}
 0x1d8   :  { %s357_s25 = scalar_lea.hbm %s476_s5, 256 }
 0x1d9   :  { %p358_p5 = scmp.ne.s32.totalorder %s476_s5, %s357_s25  ;;  %p361_p6 = scmp.lt.u32.totalorder %s357_s25, %s476_s5 }
 0x1db   :  { %p363_p7 = pnand %p361_p6, %p358_p5 }
 0x1dd   :  { %366 = shalt.err (!%p363_p7)
}
 0x1de   :  { %s371_s30 = smov 128   ;;  %s372_s1 = smov 8  }
 0x1df   :  { %256 = dma.vmem_to_hbm [thread:$0]  %s251_s22, 256, %s476_s5, [#allocation4], %s371_s30, %s371_s30, %s372_s1  }
 0x1e0   :  { %367 = dma.done.wait [#allocation4], 256  }
 0x1e1   :  { %368 = vsyncadd [#allocation4], 4294967040 }
 0x1e2   :  { %260 = vsyncpa [#allocation4], 1 }

</bundles_post_ra>
